<compile_context>
chip_gen: v7x
topology: tpu7x:2x2x1
jax: 0.10.0
libtpu: 0.0.40
codegen_flags: <defaults>
</compile_context>

<pallas_src>
import math

import jax
import jax.numpy as jnp
from jax import lax
from jax.experimental import pallas as pl
from jax.experimental.pallas import tpu as pltpu

KERNEL_SIZE = 1000   # matches nn.MaxPool1d(kernel_size=1000)
_LANES = 128         # TPU vreg lane width

# Mem-bound kernel (no MXU): small double-buffered blocks already hit the HBM
# roofline, so keep blocks modest and leave plenty of VMEM headroom.
_TARGET_BLOCK_BYTES = 2 << 20   # preferred per-block input bytes
_MAX_BLOCK_BYTES = 6 << 20      # cap for "full window in a single chunk"
_VMEM_LIMIT_BYTES = 32 << 20    # at/near default on v6e/v7x; safe on v5e


def _round_up(x, m):
    return ((x + m - 1) // m) * m


def max_pooling_forward(x, kernel_size=KERNEL_SIZE):
    """Pallas TPU implementation of MaxPooling.forward.

    x: (B, L, C) with kernel_size <= L < 2*kernel_size (exactly one pooling window,
    so squeeze(-1) yields (B, C)).  Returns max over the first kernel_size
    sequence positions, shape (B, C).
    """
    B, L, C = x.shape
    if not (kernel_size <= L < 2 * kernel_size):
        raise ValueError(
            f"forward() with squeeze(-1) requires exactly one pooling window; "
            f"got L={L}, kernel_size={kernel_size}")

    dtype = x.dtype
    itemsize = jnp.dtype(dtype).itemsize
    # dtype sublane-packing quantum (f32: 8, bf16: 16, int8/fp8: 32)
    q = {1: 32, 2: 16}.get(itemsize, 8)

    # --- lane-dense fold: (B, L, C) -> (B, L/g, g*C) with (g*C) % 128 == 0 -------
    # Free contiguous reshape; the g groups are folded back with one tiny max
    # in the epilogue.  Applied independently of any block-fit check.
    g = _LANES // math.gcd(C, _LANES)
    if g > 1 and kernel_size % g == 0 and L % g == 0:
        Ceff = g * C
        window_rows = kernel_size // g
        rows_total = L // g
        x_in = x.reshape(B, rows_total, Ceff)
    else:
        g, Ceff, window_rows, rows_total = 1, C, kernel_size, L
        x_in = x

    neg = (-jnp.inf if jnp.issubdtype(dtype, jnp.floating)
           else jnp.iinfo(dtype).min)

    row_bytes = Ceff * itemsize
    bb_min = B if B < 8 else 8   # smallest legal batch block (output sublane rule)

    # --- window tile (tl): full window per block whenever it fits at bb_min ------
    if bb_min * window_rows * row_bytes <= _MAX_BLOCK_BYTES:
        if window_rows == rows_total:
            tl = window_rows                              # exact; no mask
        else:
            # single chunk covering the window, rounded to the sublane quantum
            # (or the full sequence extent); extra rows masked in-kernel.
            tl = min(_round_up(window_rows, q), rows_total)
        n_chunks = 1
    else:
        # Rare: window itself too big for one block -> chunk it ("arbitrary" axis).
        max_tl = _MAX_BLOCK_BYTES // (bb_min * row_bytes)
        tl = max(q, (max_tl // q) * q)
        n_chunks = pl.cdiv(window_rows, tl)
    mask_needed = (n_chunks * tl) != window_rows

    # --- batch tile (bb): primary independent ("parallel") grid axis -------------
    chunk_bytes = tl * row_bytes
    bb_raw = max(1, _TARGET_BLOCK_BYTES // chunk_bytes)
    if bb_raw >= B:
        bb = B
    elif bb_raw >= 8:
        bb = (bb_raw // 8) * 8
    else:
        bb = bb_min
    n_batch_tiles = pl.cdiv(B, bb)   # partial last batch block is fine (writes masked)

    def kernel(x_ref, o_ref):
        xv = x_ref[...]
        if mask_needed:
            k = pl.program_id(1)
            row = k * tl + lax.broadcasted_iota(jnp.int32, xv.shape, 1)
            xv = jnp.where(row < window_rows, xv, neg)
        chunk_max = jnp.max(xv, axis=1)
        if n_chunks == 1:
            o_ref[...] = chunk_max
        else:
            k = pl.program_id(1)

            @pl.when(k == 0)
            def _():
                o_ref[...] = chunk_max

            @pl.when(k > 0)
            def _():
                o_ref[...] = jnp.maximum(o_ref[...], chunk_max)

    out = pl.pallas_call(
        kernel,
        out_shape=jax.ShapeDtypeStruct((B, Ceff), dtype),
        grid_spec=pltpu.PrefetchScalarGridSpec(
            num_scalar_prefetch=0,
            grid=(n_batch_tiles, n_chunks),     # window expressed via the grid;
                                                # rows beyond it are never DMA'd
            in_specs=[pl.BlockSpec((bb, tl, Ceff), lambda b, k: (b, k, 0))],
            out_specs=pl.BlockSpec((bb, Ceff), lambda b, k: (b, 0)),
        ),
        compiler_params=pltpu.CompilerParams(
            dimension_semantics=("parallel", "arbitrary"),
            vmem_limit_bytes=_VMEM_LIMIT_BYTES,
        ),
    )(x_in)

    if g > 1:
        # Fold the g lane-groups back down to the original C channels (tiny op).
        out = jnp.max(out.reshape(B, g, C), axis=1)
    return out


if __name__ == "__main__":
    key = jax.random.PRNGKey(0)

    # Shapes implied by the module: kernel_size=1000 requires L >= 1000.
    B, L, C = 2, KERNEL_SIZE, 32
    x = jax.random.normal(key, (B, L, C), dtype=jnp.float32)
    out = jax.block_until_ready(max_pooling_forward(x))
    ref = jnp.max(x[:, :KERNEL_SIZE, :], axis=1)
    assert out.shape == (B, C), out.shape
    assert jnp.allclose(out, ref), "mismatch vs reference (L == kernel_size)"

    # Exercise the masked path (L > kernel_size, extra positions ignored, no copy).
    L2 = KERNEL_SIZE + 4
    x2 = jax.random.normal(jax.random.PRNGKey(1), (B, L2, C), dtype=jnp.float32) 
    x2 = x2.at[:, KERNEL_SIZE:, :].set(1e9)  # must NOT leak into the result
    out2 = jax.block_until_ready(max_pooling_forward(x2))
    ref2 = jnp.max(x2[:, :KERNEL_SIZE, :], axis=1)
    assert out2.shape == (B, C), out2.shape
    assert jnp.allclose(out2, ref2), "mismatch vs reference (L > kernel_size)"

    print("KERNEL_OK")
</pallas_src>

<mosaic_0001>
module attributes {stable_mosaic.version = 11 : i64} {
  func.func @kernel(%arg0: i32, %arg1: i32, %arg2: memref<2x250x128xf32, #tpu.memory_space<vmem>>, %arg3: memref<2x128xf32, #tpu.memory_space<vmem>>) attributes {dimension_semantics = [#tpu.dimension_semantics<parallel>, #tpu.dimension_semantics<arbitrary>], iteration_bounds = array<i64: 1, 1>, scalar_prefetch = 0 : i64, scratch_operands = 0 : i64, tpu.core_type = #tpu.core_type<tc>, window_params = [{transform_indices = @transform_0, window_bounds = array<i64: 2, 250, 128>}, {transform_indices = @transform_1, window_bounds = array<i64: 2, 128>}]} {
    %c0 = arith.constant 0 : index
    %c0_0 = arith.constant 0 : index
    %c0_1 = arith.constant 0 : index
    %0 = vector.load %arg2[%c0, %c0_0, %c0_1] : memref<2x250x128xf32, #tpu.memory_space<vmem>>, vector<2x250x128xf32>
    %cst = arith.constant dense<0xFF800000> : vector<2x128xf32>
    %1 = vector.multi_reduction <maximumf>, %0, %cst [1] : vector<2x250x128xf32> to vector<2x128xf32>
    %c0_2 = arith.constant 0 : index
    %c0_3 = arith.constant 0 : index
    %2 = vector.load %arg3[%c0_2, %c0_3] : memref<2x128xf32, #tpu.memory_space<vmem>>, vector<2x128xf32>
    tpu.vector_store %arg3[%c0_2, %c0_3], %1 {strides = array<i32>} : memref<2x128xf32, #tpu.memory_space<vmem>>, vector<2x128xf32>,
    return
  }
  func.func @transform_0(%arg0: i32, %arg1: i32) -> (i32, i32, i32) {
    %c0_i32 = arith.constant 0 : i32
    %c0_i32_0 = arith.constant 0 : i32
    return %arg0, %arg1, %c0_i32 : i32, i32, i32
  }
  func.func @transform_1(%arg0: i32, %arg1: i32) -> (i32, i32) {
    %c0_i32 = arith.constant 0 : i32
    %c0_i32_0 = arith.constant 0 : i32
    return %arg0, %c0_i32 : i32, i32
  }
}

</mosaic_0001>

<bundles_post_ra>
// kernel: tpu_custom_call.1
= control target key start
LH: loop header
LB: loop body
LE: loop exit
PB: predicated region body
PF: predicated region fallthrough
CT: control target
= control target key end

     0   :  { %6 = vsyncpa [#allocation3], 0  ;;  %vm102_vm0 = vcmask 1041408   ;;  %s195_s18 = smov [#allocation2]   ;;  %vm152_vm1 = vcmask 1041409   ;;  %s412_s0 = inlined_call_operand.vmem [shape: f32[2,250,128], index: 0, kind: input, shape index: {}]   ;;  %s413_s1 = inlined_call_operand.hbm [shape: f32[2,128], index: 1, kind: output, shape index: {}]  }
   0x1   :  { %v9_v0 = vld [vmem:[%s412_s0] sm:$0xff]  ;;  %v10_v1 = vld [vmem:[%s412_s0 + $0x8] sm:$0xff]  ;;  %v11_v2 = vld [vmem:[%s412_s0 + $0x10] sm:$0xff]  ;;  %s162_s19 = sshll.u32 %s195_s18, 4  ;;  %s163_s19 = int_to_ptr.vmem [resolvable:$true] %s162_s19 }
   0x2   :  { %v12_v3 = vld [vmem:[%s412_s0 + $0x18] sm:$0xff]  ;;  %v13_v4 = vld [vmem:[%s412_s0 + $0x20] sm:$0xff]  ;;  %v14_v5 = vld [vmem:[%s412_s0 + $0x28] sm:$0xff]  ;;  %v73_v6 = vmax.f32 %v9_v0, %v11_v2  ;;  %p176_p1 = scmp.lt.s32.totalorder %s163_s19, %s163_s19 }
   0x3   :  { %v74_v7 = vmax.f32 %v10_v1, %v12_v3  ;;  %v15_v8 = vld [vmem:[%s412_s0 + $0x30] sm:$0xff]  ;;  %v16_v9 = vld [vmem:[%s412_s0 + $0x38] sm:$0xff]  ;;  %v17_v12 = vld [vmem:[%s412_s0 + $0x40] sm:$0xff] }
   0x4   :  { %v75_v10 = vmax.f32 %v73_v6, %v13_v4  ;;  %v18_v13 = vld [vmem:[%s412_s0 + $0x48] sm:$0xff]  ;;  %v19_v16 = vld [vmem:[%s412_s0 + $0x50] sm:$0xff]  ;;  %v20_v17 = vld [vmem:[%s412_s0 + $0x58] sm:$0xff] }
   0x5   :  { %v76_v11 = vmax.f32 %v74_v7, %v14_v5  ;;  %v21_v20 = vld [vmem:[%s412_s0 + $0x60] sm:$0xff]  ;;  %v22_v23 = vld [vmem:[%s412_s0 + $0x68] sm:$0xff]  ;;  %v47_v27 = vld [vmem:[%s412_s0 + $0x130] sm:$0xff] }
   0x6   :  { %v77_v14 = vmax.f32 %v75_v10, %v15_v8  ;;  %v45_v24 = vld [vmem:[%s412_s0 + $0x120] sm:$0xff]  ;;  %v46_v25 = vld [vmem:[%s412_s0 + $0x128] sm:$0xff]  ;;  %v48_v28 = vld [vmem:[%s412_s0 + $0x138] sm:$0xff] }
   0x7   :  { %v78_v15 = vmax.f32 %v76_v11, %v16_v9  ;;  %v114_v26 = vmax.f32 %v46_v25, %v45_v24  ;;  %v23_v32 = vld [vmem:[%s412_s0 + $0x70] sm:$0xff]  ;;  %v24_v33 = vld [vmem:[%s412_s0 + $0x78] sm:$0xff]  ;;  %v49_v34 = vld [vmem:[%s412_s0 + $0x140] sm:$0xff] }
   0x8   :  { %v79_v18 = vmax.f32 %v77_v14, %v17_v12  ;;  %v50_v36 = vld [vmem:[%s412_s0 + $0x148] sm:$0xff]  ;;  %v25_v40 = vld [vmem:[%s412_s0 + $0x80] sm:$0xff]  ;;  %v51_v42 = vld [vmem:[%s412_s0 + $0x150] sm:$0xff] }
   0x9   :  { %v80_v19 = vmax.f32 %v78_v15, %v18_v13  ;;  %v115_v29 = vmax.f32 %v47_v27, %v114_v26  ;;  %v26_v41 = vld [vmem:[%s412_s0 + $0x88] sm:$0xff]  ;;  %v52_v44 = vld [vmem:[%s412_s0 + $0x158] sm:$0xff]  ;;  %v27_v48 = vld [vmem:[%s412_s0 + $0x90] sm:$0xff] }
   0xa   :  { %v81_v21 = vmax.f32 %v79_v18, %v19_v16  ;;  %v28_v49 = vld [vmem:[%s412_s0 + $0x98] sm:$0xff]  ;;  %v53_v50 = vld [vmem:[%s412_s0 + $0x160] sm:$0xff]  ;;  %v54_v52 = vld [vmem:[%s412_s0 + $0x168] sm:$0xff] }
   0xb   :  { %v82_v22 = vmax.f32 %v80_v19, %v20_v17  ;;  %v116_v35 = vmax.f32 %v48_v28, %v115_v29  ;;  %v29_v56 = vld [vmem:[%s412_s0 + $0xa0] sm:$0xff]  ;;  %v30_v57 = vld [vmem:[%s412_s0 + $0xa8] sm:$0xff]  ;;  %v55_v58 = vld [vmem:[%s412_s0 + $0x170] sm:$0xff] }
   0xc   :  { %v83_v30 = vmax.f32 %v81_v21, %v21_v20  ;;  %v56_v60 = vld [vmem:[%s412_s0 + $0x178] sm:$0xff]  ;;  %v31_v0 = vld [vmem:[%s412_s0 + $0xb0] sm:$0xff]  ;;  %v57_v2 = vld [vmem:[%s412_s0 + $0x180] sm:$0xff] }
   0xd   :  { %v84_v31 = vmax.f32 %v82_v22, %v22_v23  ;;  %v117_v37 = vmax.f32 %v49_v34, %v116_v35  ;;  %v32_v1 = vld [vmem:[%s412_s0 + $0xb8] sm:$0xff]  ;;  %v58_v4 = vld [vmem:[%s412_s0 + $0x188] sm:$0xff]  ;;  %v33_v8 = vld [vmem:[%s412_s0 + $0xc0] sm:$0xff] }
   0xe   :  { %v85_v38 = vmax.f32 %v83_v30, %v23_v32  ;;  %v34_v9 = vld [vmem:[%s412_s0 + $0xc8] sm:$0xff]  ;;  %v59_v10 = vld [vmem:[%s412_s0 + $0x190] sm:$0xff]  ;;  %v60_v12 = vld [vmem:[%s412_s0 + $0x198] sm:$0xff] }
   0xf   :  { %v86_v39 = vmax.f32 %v84_v31, %v24_v33  ;;  %v118_v43 = vmax.f32 %v50_v36, %v117_v37  ;;  %v35_v16 = vld [vmem:[%s412_s0 + $0xd0] sm:$0xff]  ;;  %v36_v17 = vld [vmem:[%s412_s0 + $0xd8] sm:$0xff]  ;;  %v61_v18 = vld [vmem:[%s412_s0 + $0x1a0] sm:$0xff] }
  0x10   :  { %v87_v46 = vmax.f32 %v85_v38, %v25_v40  ;;  %v62_v20 = vld [vmem:[%s412_s0 + $0x1a8] sm:$0xff]  ;;  %v37_v24 = vld [vmem:[%s412_s0 + $0xe0] sm:$0xff]  ;;  %v63_v26 = vld [vmem:[%s412_s0 + $0x1b0] sm:$0xff] }
  0x11   :  { %v119_v45 = vmax.f32 %v51_v42, %v118_v43  ;;  %v88_v47 = vmax.f32 %v86_v39, %v26_v41  ;;  %v38_v25 = vld [vmem:[%s412_s0 + $0xe8] sm:$0xff]  ;;  %v40_v27 = vld [vmem:[%s412_s0 + $0xf8] sm:$0x3]  ;;  %v39_v33 = vld [vmem:[%s412_s0 + $0xf0] sm:$0xff] }
  0x12   :  { %v89_v54 = vmax.f32 %v87_v46, %v27_v48  ;;  %v64_v29 = vld [vmem:[%s412_s0 + $0x1b8] sm:$0xff]  ;;  %v65_v34 = vld [vmem:[%s412_s0 + $0x1c0] sm:$0xff]  ;;  %v103_v35 = vsel %vm102_vm0, %v40_v27, -inf  ;;  %v66_v37 = vld [vmem:[%s412_s0 + $0x1c8] sm:$0xff] }
  0x13   :  { %v120_v51 = vmax.f32 %v52_v44, %v119_v45  ;;  %v90_v55 = vmax.f32 %v88_v47, %v28_v49  ;;  %v67_v41 = vld [vmem:[%s412_s0 + $0x1d0] sm:$0xff]  ;;  %v68_v43 = vld [vmem:[%s412_s0 + $0x1d8] sm:$0xff]  ;;  %v69_v46 = vld [vmem:[%s412_s0 + $0x1e0] sm:$0xff] }
  0x14   :  { %v91_v62 = vmax.f32 %v89_v54, %v29_v56  ;;  %v41_v48 = vld [vmem:[%s412_s0 + $0x100] sm:$0xff]  ;;  %v43_v49 = vld [vmem:[%s412_s0 + $0x110] sm:$0xff]  ;;  %v44_v54 = vld [vmem:[%s412_s0 + $0x118] sm:$0xff] }
  0x15   :  { %v121_v53 = vmax.f32 %v53_v50, %v120_v51  ;;  %v92_v63 = vmax.f32 %v90_v55, %v30_v57  ;;  %v70_v50 = vld [vmem:[%s412_s0 + $0x1e8] sm:$0xff]  ;;  %v71_v55 = vld [vmem:[%s412_s0 + $0x1f0] sm:$0xff]  ;;  %v112_v57 = vmax.f32 %v41_v48, %v43_v49 }
  0x16   :  { %v93_v6 = vmax.f32 %v91_v62, %v31_v0 }
  0x17   :  { %v122_v59 = vmax.f32 %v54_v52, %v121_v53  ;;  %v94_v7 = vmax.f32 %v92_v63, %v32_v1  ;;  %v42_v53 = vld [vmem:[%s412_s0 + $0x108] sm:$0xff] }
  0x18   :  { %v95_v14 = vmax.f32 %v93_v6, %v33_v8 }
  0x19   :  { %v123_v61 = vmax.f32 %v55_v58, %v122_v59  ;;  %v96_v15 = vmax.f32 %v94_v7, %v34_v9  ;;  %v72_v59 = vld [vmem:[%s412_s0 + $0x1f8] sm:$0x3]  ;;  %s171_s0 = scalar_lea.vmem %s163_s19, 32 }
  0x1a   :  { %v97_v22 = vmax.f32 %v95_v14, %v35_v16  ;;  %v141_v63 = vsel %vm102_vm0, %v72_v59, -inf  ;;  %p172_p0 = scmp.ne.s32.totalorder %s163_s19, %s171_s0  ;;  %p177_p2 = scmp.lt.s32.totalorder %s171_s0, %s171_s0 }
  0x1b   :  { %v124_v3 = vmax.f32 %v56_v60, %v123_v61  ;;  %v98_v23 = vmax.f32 %v96_v15, %v36_v17  ;;  %v113_v61 = vmax.f32 %v42_v53, %v44_v54 }
  0x1c   :  { %v99_v31 = vmax.f32 %v97_v22, %v37_v24  ;;  %p178_p3 = por %p177_p2, %p176_p1 }
  0x1d   :  { %v125_v5 = vmax.f32 %v57_v2, %v124_v3  ;;  %v100_v32 = vmax.f32 %v98_v23, %v38_v25 }
  0x1e   :  { %v101_v39 = vmax.f32 %v99_v31, %v39_v33  ;;  %p179_p4 = pnand %p178_p3, %p172_p0 }
  0x1f   :  { %v126_v11 = vmax.f32 %v58_v4, %v125_v5  ;;  %v104_v40 = vmax.f32 %v100_v32, %v103_v35 }
  0x21   :  { %v127_v13 = vmax.f32 %v59_v10, %v126_v11  ;;  %v105_v45 = vmax.f32 %v101_v39, %v104_v40 }
  0x23   :  { %v128_v19 = vmax.f32 %v60_v12, %v127_v13  ;;  %v106_v52 = vrot.slane %v105_v45, 4 }
  0x25   :  { %v129_v21 = vmax.f32 %v61_v18, %v128_v19  ;;  %v107_v60 = vmax.f32 %v105_v45, %v106_v52 }
  0x27   :  { %v130_v28 = vmax.f32 %v62_v20, %v129_v21  ;;  %v108_v0 = vrot.slane %v107_v60, 2 }
  0x29   :  { %v131_v30 = vmax.f32 %v63_v26, %v130_v28  ;;  %v109_v3 = vmax.f32 %v107_v60, %v108_v0 }
  0x2b   :  { %v132_v36 = vmax.f32 %v64_v29, %v131_v30  ;;  %v110_v6 = vrot.slane %v109_v3, 1 }
  0x2d   :  { %v133_v38 = vmax.f32 %v65_v34, %v132_v36  ;;  %v111_v9 = vmax.f32 %v109_v3, %v110_v6 }
  0x2f   :  { %v134_v42 = vmax.f32 %v66_v37, %v133_v38 }
  0x31   :  { %v135_v44 = vmax.f32 %v67_v41, %v134_v42 }
  0x33   :  { %v136_v47 = vmax.f32 %v68_v43, %v135_v44 }
  0x35   :  { %v137_v51 = vmax.f32 %v69_v46, %v136_v47 }
  0x37   :  { %v138_v56 = vmax.f32 %v70_v50, %v137_v51 }
  0x39   :  { %v139_v58 = vmax.f32 %v71_v55, %v138_v56 }
  0x3b   :  { %v140_v62 = vmax.f32 %v112_v57, %v139_v58 }
  0x3d   :  { %v142_v1 = vmax.f32 %v113_v61, %v140_v62 }
  0x3f   :  { %v143_v2 = vmax.f32 %v141_v63, %v142_v1 }
  0x41   :  { %v144_v4 = vrot.slane %v143_v2, 4 }
  0x43   :  { %v145_v5 = vmax.f32 %v143_v2, %v144_v4 }
  0x45   :  { %v146_v7 = vrot.slane %v145_v5, 2 }
  0x47   :  { %v147_v8 = vmax.f32 %v145_v5, %v146_v7 }
  0x49   :  { %v148_v10 = vrot.slane %v147_v8, 1 }
  0x4b   :  { %v149_v11 = vmax.f32 %v147_v8, %v148_v10 }
  0x4d   :  { %v153_v12 = vsel %vm152_vm1, %v149_v11, %v111_v9 }
  0x4e   :  { %155 = vst [vmem:[#allocation2] sm:$0x3] %v153_v12 }
  0x4f   :  { %182 = shalt.err (!%p179_p4)
}
  0x50   :  { %s183_s22 = scalar_lea.hbm %s413_s1, 32 }
  0x51   :  { %p184_p5 = scmp.ne.s32.totalorder %s413_s1, %s183_s22  ;;  %p187_p6 = scmp.lt.u32.totalorder %s183_s22, %s413_s1 }
  0x53   :  { %p189_p7 = pnand %p187_p6, %p184_p5 }
  0x55   :  { %192 = shalt.err (!%p189_p7)
}
  0x56   :  { %165 = dma.vmem_to_hbm [thread:$0]  %s163_s19, 32, %s413_s1, [#allocation3]  }
  0x57   :  { %193 = dma.done.wait [#allocation3], 32  }
  0x58   :  { %194 = vsyncadd [#allocation3], 4294967264 }
  0x59   :  { %169 = vsyncpa [#allocation3], 1 }

</bundles_post_ra>
